<compile_context>
chip_gen: v7x
topology: tpu7x:2x2x1
jax: 0.10.0
libtpu: 0.0.40
codegen_flags: <defaults>
</compile_context>

<pallas_src>
import numpy as np
import jax
import jax.numpy as jnp
from jax.experimental import pallas as pl
from jax.experimental.pallas import tpu as pltpu

# ----------------------------- configuration --------------------------------
N = 2                      # batch
C, H, W = 3, 16, 16        # input_dim (C, H, W)
F = 8                      # num_filters
K = 5                      # kernel_size
P = (K - 1) // 2           # padding -> conv preserves H, W (stride_conv = 1)
POOL, SP = 2, 2            # pool window / stride
HP = (H - POOL) // SP + 1  # pooled height (matches module arithmetic)
WP = (W - POOL) // SP + 1  # pooled width
HIDDEN = 32                # hidden_dim
CLASSES = 10               # num_classes
D = F * HP * WP            # flattened size feeding fc1 (= 512)
WPC = (W + 2 * P) * C      # one padded input row, (w, c) flattened  (= 60)
KWPC = K * WPC             # im2col contraction depth over (kh, wpad, c) (= 300)
WF = W * F                 # one conv output row, (w, f) flattened   (= 128)
PWF = WP * F               # one pooled output row, (wp, f) flattened (= 64)
WEIGHT_SCALE = 0.001       # conv weight scale (as in the module)
DROPOUT_P = 0.0            # default dropout -> identity


# ------------------------ fused kernel: conv->logits --------------------------
def fused_cnn_kernel(x_ref, wb_ref, cb_ref, w1_ref, b1_ref, w2_ref, b2_ref,
                     o_ref, xpad, patch, conv_buf, pool_buf, flat_buf):
    # x_ref  : (N, H, W*C)      unpadded input rows, (w, c) flattened on lanes
    # wb_ref : (K*WPC, W*F)     banded im2col conv weight
    # cb_ref : (1, W*F)         conv bias tiled over w
    # w1_ref : (D, HIDDEN)      fc1 weight, rows permuted to (hp, wp, f) order
    # b1_ref : (1, HIDDEN)      fc1 bias
    # w2_ref : (HIDDEN, CLASSES), b2_ref : (1, CLASSES)
    # o_ref  : (N, CLASSES)     logits - the only HBM write of the whole net
    # scratch: xpad (N, H+2P, WPC), patch (N*H, K*WPC), conv_buf (N*H, W*F),
    #          pool_buf (N*HP, WP*F), flat_buf (N, D)

    # 1) zero-pad inside VMEM (replaces the XLA-side jnp.pad)
    xpad[...] = jnp.zeros(xpad.shape, xpad.dtype)
    for n in range(N):
        xpad[n, P:P + H, P * C:(P + W) * C] = x_ref[n]

    # 2) kh-im2col: patch row (n, h) holds padded rows h..h+K-1, so the whole
    #    conv becomes ONE lane-dense matmul (N*H, 300) @ (300, 128).
    for n in range(N):
        for kh in range(K):
            patch[n * H:(n + 1) * H, kh * WPC:(kh + 1) * WPC] = \
                xpad[n, kh:kh + H, :]

    # 3) single conv matmul + bias + ReLU; activations stay lane-dense (32, 128)
    conv = jnp.dot(patch[...], wb_ref[...], preferred_element_type=jnp.float32)
    conv_buf[...] = jnp.maximum(conv + cb_ref[...], 0.0)

    # 4) 2x2 / stride-2 max pool
    #    pool over h: one batched pair of strided sublane reads (even/odd rows)
    hmax = jnp.maximum(conv_buf[pl.ds(0, N * HP, stride=2), :],
                       conv_buf[pl.ds(1, N * HP, stride=2), :])   # (N*HP, W*F)
    #    pool over w: adjacent F-wide lane groups
    for j in range(WP):
        pool_buf[:, j * F:(j + 1) * F] = jnp.maximum(
            hmax[:, (2 * j) * F:(2 * j) * F + F],
            hmax[:, (2 * j + 1) * F:(2 * j + 1) * F + F])

    # 5) flatten to (N, D): fold the hp rows of each sample onto lanes.
    #    (the PyTorch NCHW channel-major order is absorbed into the
    #     pre-permuted fc1 weight, so no in-kernel transpose is needed.)
    for hp in range(HP):
        flat_buf[:, hp * PWF:(hp + 1) * PWF] = \
            pool_buf[pl.ds(hp, N, stride=HP), :]

    # 6) fc1 + (dropout p=0.0 -> identity) + ReLU + fc2
    h1 = jnp.dot(flat_buf[...], w1_ref[...],
                 preferred_element_type=jnp.float32) + b1_ref[...]
    # TODO(synk): for p>0 training-mode dropout use pltpu.prng_seed +
    #             pltpu.stateful_bernoulli and scale by 1/(1-p).
    h1 = jnp.maximum(h1, 0.0)
    o_ref[...] = (jnp.dot(h1, w2_ref[...], preferred_element_type=jnp.float32)
                  + b2_ref[...]).astype(o_ref.dtype)


def fused_cnn(x_rows, wb, cb, w1p, b1, w2, b2):
    return pl.pallas_call(
        fused_cnn_kernel,
        out_shape=jax.ShapeDtypeStruct((N, CLASSES), jnp.float32),
        grid_spec=pltpu.PrefetchScalarGridSpec(
            num_scalar_prefetch=0,
            grid=(1,),                 # whole batch fused into a single step
            in_specs=[
                pl.BlockSpec((N, H, W * C), lambda i: (0, 0, 0)),
                pl.BlockSpec((KWPC, WF), lambda i: (0, 0)),
                pl.BlockSpec((1, WF), lambda i: (0, 0)),
                pl.BlockSpec((D, HIDDEN), lambda i: (0, 0)),
                pl.BlockSpec((1, HIDDEN), lambda i: (0, 0)),
                pl.BlockSpec((HIDDEN, CLASSES), lambda i: (0, 0)),
                pl.BlockSpec((1, CLASSES), lambda i: (0, 0)),
            ],
            out_specs=pl.BlockSpec((N, CLASSES), lambda i: (0, 0)),
            scratch_shapes=[
                pltpu.VMEM((N, H + 2 * P, WPC), jnp.float32),   # padded input
                pltpu.VMEM((N * H, KWPC), jnp.float32),         # im2col patches
                pltpu.VMEM((N * H, WF), jnp.float32),           # relu'd conv
                pltpu.VMEM((N * HP, PWF), jnp.float32),         # pooled
                pltpu.VMEM((N, D), jnp.float32),                # flattened
            ],
        ),
        # Single fused step; if the batch grows, split it over a leading
        # "parallel" grid axis so both v7x TensorCores are used.
        compiler_params=pltpu.CompilerParams(
            dimension_semantics=("arbitrary",)),
    )(x_rows, wb, cb, w1p, b1, w2, b2)


# ----------------------- one-time parameter re-layout -------------------------
def prepare_params(params):
    """Re-layout PyTorch-convention parameters for the fused kernel (one-time)."""
    conv_w, conv_b, fc1_w, fc1_b, fc2_w, fc2_b = params

    # Banded im2col conv weight:
    #   Wb[kh*WPC + (w+kw)*C + c, w*F + f] = conv_w[f, c, kh, kw]
    kh, kw, c, w, f = np.meshgrid(np.arange(K), np.arange(K), np.arange(C),
                                  np.arange(W), np.arange(F), indexing="ij")
    rows = (kh * WPC + (w + kw) * C + c).reshape(-1)
    cols = (w * F + f).reshape(-1)
    vals = jnp.broadcast_to(
        jnp.transpose(conv_w, (2, 3, 1, 0))[:, :, :, None, :],   # (K,K,C,1,F)
        (K, K, C, W, F)).reshape(-1)
    wb = jnp.zeros((KWPC, WF), jnp.float32).at[rows, cols].set(vals)

    cb = jnp.tile(conv_b, W).reshape(1, WF)          # bias per (w, f) lane

    # fc1 weight rows permuted from PyTorch NCHW-flatten order (f, hp, wp)
    # to the kernel's natural flatten order (hp, wp, f).
    perm = np.array([fi * (HP * WP) + hpi * WP + wpi
                     for hpi in range(HP) for wpi in range(WP) for fi in range(F)],
                    dtype=np.int32)
    w1p = fc1_w.T[perm]                              # (D, HIDDEN)

    return (wb, cb, w1p, fc1_b.reshape(1, HIDDEN),
            fc2_w.T, fc2_b.reshape(1, CLASSES))


# ------------------------------ full forward ---------------------------------
@jax.jit
def classification_cnn_forward(x_nchw, prepared):
    wb, cb, w1p, b1, w2, b2 = prepared
    # The only XLA-side glue left: NCHW -> (N, H, W*C) row layout.
    # (No jnp.pad, no inter-kernel transpose/flatten - all inside the kernel.)
    x_rows = jnp.transpose(x_nchw, (0, 2, 3, 1)).reshape(N, H, W * C)
    return fused_cnn(x_rows, wb, cb, w1p, b1, w2, b2)


# --------------------------- numpy reference ---------------------------------
def reference_forward_np(x, conv_w, conv_b, fc1_w, fc1_b, fc2_w, fc2_b):
    x = np.asarray(x, np.float64)
    conv_w = np.asarray(conv_w, np.float64)
    xp = np.pad(x, ((0, 0), (0, 0), (P, P), (P, P)))
    conv = np.zeros((N, F, H, W), np.float64)
    for kh in range(K):
        for kw in range(K):
            patch = xp[:, :, kh:kh + H, kw:kw + W]            # (N, C, H, W)
            conv += np.einsum('nchw,fc->nfhw', patch, conv_w[:, :, kh, kw])
    conv += np.asarray(conv_b, np.float64)[None, :, None, None]
    conv = np.maximum(conv, 0.0)
    pooled = conv.reshape(N, F, HP, 2, WP, 2).max(axis=(3, 5))
    flat = pooled.reshape(N, -1)
    h = np.maximum(flat @ np.asarray(fc1_w, np.float64).T
                   + np.asarray(fc1_b, np.float64), 0.0)
    return h @ np.asarray(fc2_w, np.float64).T + np.asarray(fc2_b, np.float64)


# ----------------------------------- main ------------------------------------
if __name__ == "__main__":
    key = jax.random.PRNGKey(0)
    kx, k1, k2, k3, k4, k5, k6 = jax.random.split(key, 7)

    x = jax.random.normal(kx, (N, C, H, W), jnp.float32)

    # deterministic synthetic parameters (PyTorch-convention shapes)
    conv_w = (WEIGHT_SCALE * jax.random.normal(k1, (F, C, K, K))).astype(jnp.float32)
    conv_b = (0.05 * jax.random.normal(k2, (F,))).astype(jnp.float32)
    fc1_w = (0.05 * jax.random.normal(k3, (HIDDEN, D))).astype(jnp.float32)
    fc1_b = (0.05 * jax.random.normal(k4, (HIDDEN,))).astype(jnp.float32)
    fc2_w = (0.1 * jax.random.normal(k5, (CLASSES, HIDDEN))).astype(jnp.float32)
    fc2_b = (0.1 * jax.random.normal(k6, (CLASSES,))).astype(jnp.float32)
    params = (conv_w, conv_b, fc1_w, fc1_b, fc2_w, fc2_b)

    prepared = prepare_params(params)            # one-time weight re-layout
    logits = classification_cnn_forward(x, prepared)
    logits = jax.block_until_ready(logits)

    ref = reference_forward_np(x, *params)
    np.testing.assert_allclose(np.asarray(logits), ref, rtol=1e-3, atol=5e-4)

    print("KERNEL_OK")
</pallas_src>

<mosaic_0001>
module attributes {stable_mosaic.version = 11 : i64} {
  func.func @fused_cnn_kernel(%arg0: i32, %arg1: memref<2x16x48xf32, #tpu.memory_space<vmem>>, %arg2: memref<300x128xf32, #tpu.memory_space<vmem>>, %arg3: memref<1x128xf32, #tpu.memory_space<vmem>>, %arg4: memref<512x32xf32, #tpu.memory_space<vmem>>, %arg5: memref<1x32xf32, #tpu.memory_space<vmem>>, %arg6: memref<32x10xf32, #tpu.memory_space<vmem>>, %arg7: memref<1x10xf32, #tpu.memory_space<vmem>>, %arg8: memref<2x10xf32, #tpu.memory_space<vmem>>, %arg9: memref<2x20x60xf32, #tpu.memory_space<vmem>>, %arg10: memref<32x300xf32, #tpu.memory_space<vmem>>, %arg11: memref<32x128xf32, #tpu.memory_space<vmem>>, %arg12: memref<16x64xf32, #tpu.memory_space<vmem>>, %arg13: memref<2x512xf32, #tpu.memory_space<vmem>>) attributes {dimension_semantics = [#tpu.dimension_semantics<arbitrary>], iteration_bounds = array<i64: 1>, scalar_prefetch = 0 : i64, scratch_operands = 5 : i64, tpu.core_type = #tpu.core_type<tc>, window_params = [{pipeline_mode = #tpu.pipeline_mode<synchronous>, transform_indices = @transform_0, window_bounds = array<i64: 2, 16, 48>}, {pipeline_mode = #tpu.pipeline_mode<synchronous>, transform_indices = @transform_1, window_bounds = array<i64: 300, 128>}, {pipeline_mode = #tpu.pipeline_mode<synchronous>, transform_indices = @transform_2, window_bounds = array<i64: 1, 128>}, {pipeline_mode = #tpu.pipeline_mode<synchronous>, transform_indices = @transform_3, window_bounds = array<i64: 512, 32>}, {pipeline_mode = #tpu.pipeline_mode<synchronous>, transform_indices = @transform_4, window_bounds = array<i64: 1, 32>}, {pipeline_mode = #tpu.pipeline_mode<synchronous>, transform_indices = @transform_5, window_bounds = array<i64: 32, 10>}, {pipeline_mode = #tpu.pipeline_mode<synchronous>, transform_indices = @transform_6, window_bounds = array<i64: 1, 10>}, {pipeline_mode = #tpu.pipeline_mode<synchronous>, transform_indices = @transform_7, window_bounds = array<i64: 2, 10>}]} {
    %cst = arith.constant 0.000000e+00 : f32
    %0 = vector.broadcast %cst : f32 to vector<2x20x60xf32>
    %c0 = arith.constant 0 : index
    %c0_0 = arith.constant 0 : index
    %c0_1 = arith.constant 0 : index
    %1 = vector.load %arg9[%c0, %c0_0, %c0_1] : memref<2x20x60xf32, #tpu.memory_space<vmem>>, vector<2x20x60xf32>
    tpu.vector_store %arg9[%c0, %c0_0, %c0_1], %0 {strides = array<i32>} : memref<2x20x60xf32, #tpu.memory_space<vmem>>, vector<2x20x60xf32>,
    %c0_2 = arith.constant 0 : index
    %c0_3 = arith.constant 0 : index
    %c0_4 = arith.constant 0 : index
    %2 = vector.load %arg1[%c0_2, %c0_3, %c0_4] : memref<2x16x48xf32, #tpu.memory_space<vmem>>, vector<1x16x48xf32>
    %3 = vector.shape_cast %2 : vector<1x16x48xf32> to vector<16x48xf32>
    %c0_5 = arith.constant 0 : index
    %c2 = arith.constant 2 : index
    %c6 = arith.constant 6 : index
    %4 = vector.load %arg9[%c0_5, %c2, %c6] : memref<2x20x60xf32, #tpu.memory_space<vmem>>, vector<1x16x48xf32>
    %5 = vector.shape_cast %4 : vector<1x16x48xf32> to vector<16x48xf32>
    %6 = vector.shape_cast %3 : vector<16x48xf32> to vector<1x16x48xf32>
    tpu.vector_store %arg9[%c0_5, %c2, %c6], %6 {strides = array<i32>} : memref<2x20x60xf32, #tpu.memory_space<vmem>>, vector<1x16x48xf32>,
    %c1 = arith.constant 1 : index
    %c0_6 = arith.constant 0 : index
    %c0_7 = arith.constant 0 : index
    %7 = vector.load %arg1[%c1, %c0_6, %c0_7] : memref<2x16x48xf32, #tpu.memory_space<vmem>>, vector<1x16x48xf32>
    %8 = vector.shape_cast %7 : vector<1x16x48xf32> to vector<16x48xf32>
    %c1_8 = arith.constant 1 : index
    %c2_9 = arith.constant 2 : index
    %c6_10 = arith.constant 6 : index
    %9 = vector.load %arg9[%c1_8, %c2_9, %c6_10] : memref<2x20x60xf32, #tpu.memory_space<vmem>>, vector<1x16x48xf32>
    %10 = vector.shape_cast %9 : vector<1x16x48xf32> to vector<16x48xf32>
    %11 = vector.shape_cast %8 : vector<16x48xf32> to vector<1x16x48xf32>
    tpu.vector_store %arg9[%c1_8, %c2_9, %c6_10], %11 {strides = array<i32>} : memref<2x20x60xf32, #tpu.memory_space<vmem>>, vector<1x16x48xf32>,
    %c0_11 = arith.constant 0 : index
    %c0_12 = arith.constant 0 : index
    %c0_13 = arith.constant 0 : index
    %12 = vector.load %arg9[%c0_11, %c0_12, %c0_13] : memref<2x20x60xf32, #tpu.memory_space<vmem>>, vector<1x16x60xf32>
    %13 = vector.shape_cast %12 : vector<1x16x60xf32> to vector<16x60xf32>
    %c0_14 = arith.constant 0 : index
    %c0_15 = arith.constant 0 : index
    %14 = vector.load %arg10[%c0_14, %c0_15] : memref<32x300xf32, #tpu.memory_space<vmem>>, vector<16x60xf32>
    tpu.vector_store %arg10[%c0_14, %c0_15], %13 {strides = array<i32>} : memref<32x300xf32, #tpu.memory_space<vmem>>, vector<16x60xf32>,
    %c0_16 = arith.constant 0 : index
    %c1_17 = arith.constant 1 : index
    %c0_18 = arith.constant 0 : index
    %15 = vector.load %arg9[%c0_16, %c1_17, %c0_18] : memref<2x20x60xf32, #tpu.memory_space<vmem>>, vector<1x16x60xf32>
    %16 = vector.shape_cast %15 : vector<1x16x60xf32> to vector<16x60xf32>
    %c0_19 = arith.constant 0 : index
    %c60 = arith.constant 60 : index
    %17 = vector.load %arg10[%c0_19, %c60] : memref<32x300xf32, #tpu.memory_space<vmem>>, vector<16x60xf32>
    tpu.vector_store %arg10[%c0_19, %c60], %16 {strides = array<i32>} : memref<32x300xf32, #tpu.memory_space<vmem>>, vector<16x60xf32>,
    %c0_20 = arith.constant 0 : index
    %c2_21 = arith.constant 2 : index
    %c0_22 = arith.constant 0 : index
    %18 = vector.load %arg9[%c0_20, %c2_21, %c0_22] : memref<2x20x60xf32, #tpu.memory_space<vmem>>, vector<1x16x60xf32>
    %19 = vector.shape_cast %18 : vector<1x16x60xf32> to vector<16x60xf32>
    %c0_23 = arith.constant 0 : index
    %c120 = arith.constant 120 : index
    %20 = vector.load %arg10[%c0_23, %c120] : memref<32x300xf32, #tpu.memory_space<vmem>>, vector<16x60xf32>
    tpu.vector_store %arg10[%c0_23, %c120], %19 {strides = array<i32>} : memref<32x300xf32, #tpu.memory_space<vmem>>, vector<16x60xf32>,
    %c0_24 = arith.constant 0 : index
    %c3 = arith.constant 3 : index
    %c0_25 = arith.constant 0 : index
    %21 = vector.load %arg9[%c0_24, %c3, %c0_25] : memref<2x20x60xf32, #tpu.memory_space<vmem>>, vector<1x16x60xf32>
    %22 = vector.shape_cast %21 : vector<1x16x60xf32> to vector<16x60xf32>
    %c0_26 = arith.constant 0 : index
    %c180 = arith.constant 180 : index
    %23 = vector.load %arg10[%c0_26, %c180] : memref<32x300xf32, #tpu.memory_space<vmem>>, vector<16x60xf32>
    tpu.vector_store %arg10[%c0_26, %c180], %22 {strides = array<i32>} : memref<32x300xf32, #tpu.memory_space<vmem>>, vector<16x60xf32>,
    %c0_27 = arith.constant 0 : index
    %c4 = arith.constant 4 : index
    %c0_28 = arith.constant 0 : index
    %24 = vector.load %arg9[%c0_27, %c4, %c0_28] : memref<2x20x60xf32, #tpu.memory_space<vmem>>, vector<1x16x60xf32>
    %25 = vector.shape_cast %24 : vector<1x16x60xf32> to vector<16x60xf32>
    %c0_29 = arith.constant 0 : index
    %c240 = arith.constant 240 : index
    %26 = vector.load %arg10[%c0_29, %c240] : memref<32x300xf32, #tpu.memory_space<vmem>>, vector<16x60xf32>
    tpu.vector_store %arg10[%c0_29, %c240], %25 {strides = array<i32>} : memref<32x300xf32, #tpu.memory_space<vmem>>, vector<16x60xf32>,
    %c1_30 = arith.constant 1 : index
    %c0_31 = arith.constant 0 : index
    %c0_32 = arith.constant 0 : index
    %27 = vector.load %arg9[%c1_30, %c0_31, %c0_32] : memref<2x20x60xf32, #tpu.memory_space<vmem>>, vector<1x16x60xf32>
    %28 = vector.shape_cast %27 : vector<1x16x60xf32> to vector<16x60xf32>
    %c16 = arith.constant 16 : index
    %c0_33 = arith.constant 0 : index
    %29 = vector.load %arg10[%c16, %c0_33] : memref<32x300xf32, #tpu.memory_space<vmem>>, vector<16x60xf32>
    tpu.vector_store %arg10[%c16, %c0_33], %28 {strides = array<i32>} : memref<32x300xf32, #tpu.memory_space<vmem>>, vector<16x60xf32>,
    %c1_34 = arith.constant 1 : index
    %c1_35 = arith.constant 1 : index
    %c0_36 = arith.constant 0 : index
    %30 = vector.load %arg9[%c1_34, %c1_35, %c0_36] : memref<2x20x60xf32, #tpu.memory_space<vmem>>, vector<1x16x60xf32>
    %31 = vector.shape_cast %30 : vector<1x16x60xf32> to vector<16x60xf32>
    %c16_37 = arith.constant 16 : index
    %c60_38 = arith.constant 60 : index
    %32 = vector.load %arg10[%c16_37, %c60_38] : memref<32x300xf32, #tpu.memory_space<vmem>>, vector<16x60xf32>
    tpu.vector_store %arg10[%c16_37, %c60_38], %31 {strides = array<i32>} : memref<32x300xf32, #tpu.memory_space<vmem>>, vector<16x60xf32>,
    %c1_39 = arith.constant 1 : index
    %c2_40 = arith.constant 2 : index
    %c0_41 = arith.constant 0 : index
    %33 = vector.load %arg9[%c1_39, %c2_40, %c0_41] : memref<2x20x60xf32, #tpu.memory_space<vmem>>, vector<1x16x60xf32>
    %34 = vector.shape_cast %33 : vector<1x16x60xf32> to vector<16x60xf32>
    %c16_42 = arith.constant 16 : index
    %c120_43 = arith.constant 120 : index
    %35 = vector.load %arg10[%c16_42, %c120_43] : memref<32x300xf32, #tpu.memory_space<vmem>>, vector<16x60xf32>
    tpu.vector_store %arg10[%c16_42, %c120_43], %34 {strides = array<i32>} : memref<32x300xf32, #tpu.memory_space<vmem>>, vector<16x60xf32>,
    %c1_44 = arith.constant 1 : index
    %c3_45 = arith.constant 3 : index
    %c0_46 = arith.constant 0 : index
    %36 = vector.load %arg9[%c1_44, %c3_45, %c0_46] : memref<2x20x60xf32, #tpu.memory_space<vmem>>, vector<1x16x60xf32>
    %37 = vector.shape_cast %36 : vector<1x16x60xf32> to vector<16x60xf32>
    %c16_47 = arith.constant 16 : index
    %c180_48 = arith.constant 180 : index
    %38 = vector.load %arg10[%c16_47, %c180_48] : memref<32x300xf32, #tpu.memory_space<vmem>>, vector<16x60xf32>
    tpu.vector_store %arg10[%c16_47, %c180_48], %37 {strides = array<i32>} : memref<32x300xf32, #tpu.memory_space<vmem>>, vector<16x60xf32>,
    %c1_49 = arith.constant 1 : index
    %c4_50 = arith.constant 4 : index
    %c0_51 = arith.constant 0 : index
    %39 = vector.load %arg9[%c1_49, %c4_50, %c0_51] : memref<2x20x60xf32, #tpu.memory_space<vmem>>, vector<1x16x60xf32>
    %40 = vector.shape_cast %39 : vector<1x16x60xf32> to vector<16x60xf32>
    %c16_52 = arith.constant 16 : index
    %c240_53 = arith.constant 240 : index
    %41 = vector.load %arg10[%c16_52, %c240_53] : memref<32x300xf32, #tpu.memory_space<vmem>>, vector<16x60xf32>
    tpu.vector_store %arg10[%c16_52, %c240_53], %40 {strides = array<i32>} : memref<32x300xf32, #tpu.memory_space<vmem>>, vector<16x60xf32>,
    %c0_54 = arith.constant 0 : index
    %c0_55 = arith.constant 0 : index
    %42 = vector.load %arg10[%c0_54, %c0_55] : memref<32x300xf32, #tpu.memory_space<vmem>>, vector<32x300xf32>
    %c0_56 = arith.constant 0 : index
    %c0_57 = arith.constant 0 : index
    %43 = vector.load %arg2[%c0_56, %c0_57] : memref<300x128xf32, #tpu.memory_space<vmem>>, vector<300x128xf32>
    %cst_58 = arith.constant dense<0.000000e+00> : vector<32x128xf32>
    %44 = tpu.matmul %42, %43, %cst_58 {dimension_numbers = #tpu.dot_dimension_numbers<[1], [0], [0], [1], [0, 0, 1, 1], [], []>} : vector<32x300xf32>, vector<300x128xf32>, vector<32x128xf32> -> vector<32x128xf32>
    %c0_59 = arith.constant 0 : index
    %c0_60 = arith.constant 0 : index
    %45 = vector.load %arg3[%c0_59, %c0_60] : memref<1x128xf32, #tpu.memory_space<vmem>>, vector<1x128xf32>
    %46 = vector.broadcast %45 : vector<1x128xf32> to vector<32x128xf32>
    %47 = arith.addf %44, %46 : vector<32x128xf32>
    %cst_61 = arith.constant 0.000000e+00 : f32
    %48 = vector.broadcast %cst_61 : f32 to vector<32x128xf32>
    %49 = arith.maximumf %47, %48 : vector<32x128xf32>
    %c0_62 = arith.constant 0 : index
    %c0_63 = arith.constant 0 : index
    %50 = vector.load %arg11[%c0_62, %c0_63] : memref<32x128xf32, #tpu.memory_space<vmem>>, vector<32x128xf32>
    tpu.vector_store %arg11[%c0_62, %c0_63], %49 {strides = array<i32>} : memref<32x128xf32, #tpu.memory_space<vmem>>, vector<32x128xf32>,
    %c0_64 = arith.constant 0 : index
    %c0_65 = arith.constant 0 : index
    %51 = tpu.strided_load %arg11[%c0_64, %c0_65] {strides = array<i32: 2, 1>} : memref<32x128xf32, #tpu.memory_space<vmem>>, vector<16x128xf32>
    %c1_66 = arith.constant 1 : index
    %c0_67 = arith.constant 0 : index
    %52 = tpu.strided_load %arg11[%c1_66, %c0_67] {strides = array<i32: 2, 1>} : memref<32x128xf32, #tpu.memory_space<vmem>>, vector<16x128xf32>
    %53 = arith.maximumf %51, %52 : vector<16x128xf32>
    %54 = vector.extract_strided_slice %53 {offsets = [0, 0], sizes = [16, 8], strides = [1, 1]} : vector<16x128xf32> to vector<16x8xf32>
    %55 = vector.extract_strided_slice %53 {offsets = [0, 8], sizes = [16, 8], strides = [1, 1]} : vector<16x128xf32> to vector<16x8xf32>
    %56 = arith.maximumf %54, %55 : vector<16x8xf32>
    %c0_68 = arith.constant 0 : index
    %c0_69 = arith.constant 0 : index
    %57 = vector.load %arg12[%c0_68, %c0_69] : memref<16x64xf32, #tpu.memory_space<vmem>>, vector<16x8xf32>
    tpu.vector_store %arg12[%c0_68, %c0_69], %56 {strides = array<i32>} : memref<16x64xf32, #tpu.memory_space<vmem>>, vector<16x8xf32>,
    %58 = vector.extract_strided_slice %53 {offsets = [0, 16], sizes = [16, 8], strides = [1, 1]} : vector<16x128xf32> to vector<16x8xf32>
    %59 = vector.extract_strided_slice %53 {offsets = [0, 24], sizes = [16, 8], strides = [1, 1]} : vector<16x128xf32> to vector<16x8xf32>
    %60 = arith.maximumf %58, %59 : vector<16x8xf32>
    %c0_70 = arith.constant 0 : index
    %c8 = arith.constant 8 : index
    %61 = vector.load %arg12[%c0_70, %c8] : memref<16x64xf32, #tpu.memory_space<vmem>>, vector<16x8xf32>
    tpu.vector_store %arg12[%c0_70, %c8], %60 {strides = array<i32>} : memref<16x64xf32, #tpu.memory_space<vmem>>, vector<16x8xf32>,
    %62 = vector.extract_strided_slice %53 {offsets = [0, 32], sizes = [16, 8], strides = [1, 1]} : vector<16x128xf32> to vector<16x8xf32>
    %63 = vector.extract_strided_slice %53 {offsets = [0, 40], sizes = [16, 8], strides = [1, 1]} : vector<16x128xf32> to vector<16x8xf32>
    %64 = arith.maximumf %62, %63 : vector<16x8xf32>
    %c0_71 = arith.constant 0 : index
    %c16_72 = arith.constant 16 : index
    %65 = vector.load %arg12[%c0_71, %c16_72] : memref<16x64xf32, #tpu.memory_space<vmem>>, vector<16x8xf32>
    tpu.vector_store %arg12[%c0_71, %c16_72], %64 {strides = array<i32>} : memref<16x64xf32, #tpu.memory_space<vmem>>, vector<16x8xf32>,
    %66 = vector.extract_strided_slice %53 {offsets = [0, 48], sizes = [16, 8], strides = [1, 1]} : vector<16x128xf32> to vector<16x8xf32>
    %67 = vector.extract_strided_slice %53 {offsets = [0, 56], sizes = [16, 8], strides = [1, 1]} : vector<16x128xf32> to vector<16x8xf32>
    %68 = arith.maximumf %66, %67 : vector<16x8xf32>
    %c0_73 = arith.constant 0 : index
    %c24 = arith.constant 24 : index
    %69 = vector.load %arg12[%c0_73, %c24] : memref<16x64xf32, #tpu.memory_space<vmem>>, vector<16x8xf32>
    tpu.vector_store %arg12[%c0_73, %c24], %68 {strides = array<i32>} : memref<16x64xf32, #tpu.memory_space<vmem>>, vector<16x8xf32>,
    %70 = vector.extract_strided_slice %53 {offsets = [0, 64], sizes = [16, 8], strides = [1, 1]} : vector<16x128xf32> to vector<16x8xf32>
    %71 = vector.extract_strided_slice %53 {offsets = [0, 72], sizes = [16, 8], strides = [1, 1]} : vector<16x128xf32> to vector<16x8xf32>
    %72 = arith.maximumf %70, %71 : vector<16x8xf32>
    %c0_74 = arith.constant 0 : index
    %c32 = arith.constant 32 : index
    %73 = vector.load %arg12[%c0_74, %c32] : memref<16x64xf32, #tpu.memory_space<vmem>>, vector<16x8xf32>
    tpu.vector_store %arg12[%c0_74, %c32], %72 {strides = array<i32>} : memref<16x64xf32, #tpu.memory_space<vmem>>, vector<16x8xf32>,
    %74 = vector.extract_strided_slice %53 {offsets = [0, 80], sizes = [16, 8], strides = [1, 1]} : vector<16x128xf32> to vector<16x8xf32>
    %75 = vector.extract_strided_slice %53 {offsets = [0, 88], sizes = [16, 8], strides = [1, 1]} : vector<16x128xf32> to vector<16x8xf32>
    %76 = arith.maximumf %74, %75 : vector<16x8xf32>
    %c0_75 = arith.constant 0 : index
    %c40 = arith.constant 40 : index
    %77 = vector.load %arg12[%c0_75, %c40] : memref<16x64xf32, #tpu.memory_space<vmem>>, vector<16x8xf32>
    tpu.vector_store %arg12[%c0_75, %c40], %76 {strides = array<i32>} : memref<16x64xf32, #tpu.memory_space<vmem>>, vector<16x8xf32>,
    %78 = vector.extract_strided_slice %53 {offsets = [0, 96], sizes = [16, 8], strides = [1, 1]} : vector<16x128xf32> to vector<16x8xf32>
    %79 = vector.extract_strided_slice %53 {offsets = [0, 104], sizes = [16, 8], strides = [1, 1]} : vector<16x128xf32> to vector<16x8xf32>
    %80 = arith.maximumf %78, %79 : vector<16x8xf32>
    %c0_76 = arith.constant 0 : index
    %c48 = arith.constant 48 : index
    %81 = vector.load %arg12[%c0_76, %c48] : memref<16x64xf32, #tpu.memory_space<vmem>>, vector<16x8xf32>
    tpu.vector_store %arg12[%c0_76, %c48], %80 {strides = array<i32>} : memref<16x64xf32, #tpu.memory_space<vmem>>, vector<16x8xf32>,
    %82 = vector.extract_strided_slice %53 {offsets = [0, 112], sizes = [16, 8], strides = [1, 1]} : vector<16x128xf32> to vector<16x8xf32>
    %83 = vector.extract_strided_slice %53 {offsets = [0, 120], sizes = [16, 8], strides = [1, 1]} : vector<16x128xf32> to vector<16x8xf32>
    %84 = arith.maximumf %82, %83 : vector<16x8xf32>
    %c0_77 = arith.constant 0 : index
    %c56 = arith.constant 56 : index
    %85 = vector.load %arg12[%c0_77, %c56] : memref<16x64xf32, #tpu.memory_space<vmem>>, vector<16x8xf32>
    tpu.vector_store %arg12[%c0_77, %c56], %84 {strides = array<i32>} : memref<16x64xf32, #tpu.memory_space<vmem>>, vector<16x8xf32>,
    %c0_78 = arith.constant 0 : index
    %c0_79 = arith.constant 0 : index
    %86 = tpu.strided_load %arg12[%c0_78, %c0_79] {strides = array<i32: 8, 1>} : memref<16x64xf32, #tpu.memory_space<vmem>>, vector<2x64xf32>
    %c0_80 = arith.constant 0 : index
    %c0_81 = arith.constant 0 : index
    %87 = vector.load %arg13[%c0_80, %c0_81] : memref<2x512xf32, #tpu.memory_space<vmem>>, vector<2x64xf32>
    tpu.vector_store %arg13[%c0_80, %c0_81], %86 {strides = array<i32>} : memref<2x512xf32, #tpu.memory_space<vmem>>, vector<2x64xf32>,
    %c1_82 = arith.constant 1 : index
    %c0_83 = arith.constant 0 : index
    %88 = tpu.strided_load %arg12[%c1_82, %c0_83] {strides = array<i32: 8, 1>} : memref<16x64xf32, #tpu.memory_space<vmem>>, vector<2x64xf32>
    %c0_84 = arith.constant 0 : index
    %c64 = arith.constant 64 : index
    %89 = vector.load %arg13[%c0_84, %c64] : memref<2x512xf32, #tpu.memory_space<vmem>>, vector<2x64xf32>
    tpu.vector_store %arg13[%c0_84, %c64], %88 {strides = array<i32>} : memref<2x512xf32, #tpu.memory_space<vmem>>, vector<2x64xf32>,
    %c2_85 = arith.constant 2 : index
    %c0_86 = arith.constant 0 : index
    %90 = tpu.strided_load %arg12[%c2_85, %c0_86] {strides = array<i32: 8, 1>} : memref<16x64xf32, #tpu.memory_space<vmem>>, vector<2x64xf32>
    %c0_87 = arith.constant 0 : index
    %c128 = arith.constant 128 : index
    %91 = vector.load %arg13[%c0_87, %c128] : memref<2x512xf32, #tpu.memory_space<vmem>>, vector<2x64xf32>
    tpu.vector_store %arg13[%c0_87, %c128], %90 {strides = array<i32>} : memref<2x512xf32, #tpu.memory_space<vmem>>, vector<2x64xf32>,
    %c3_88 = arith.constant 3 : index
    %c0_89 = arith.constant 0 : index
    %92 = tpu.strided_load %arg12[%c3_88, %c0_89] {strides = array<i32: 8, 1>} : memref<16x64xf32, #tpu.memory_space<vmem>>, vector<2x64xf32>
    %c0_90 = arith.constant 0 : index
    %c192 = arith.constant 192 : index
    %93 = vector.load %arg13[%c0_90, %c192] : memref<2x512xf32, #tpu.memory_space<vmem>>, vector<2x64xf32>
    tpu.vector_store %arg13[%c0_90, %c192], %92 {strides = array<i32>} : memref<2x512xf32, #tpu.memory_space<vmem>>, vector<2x64xf32>,
    %c4_91 = arith.constant 4 : index
    %c0_92 = arith.constant 0 : index
    %94 = tpu.strided_load %arg12[%c4_91, %c0_92] {strides = array<i32: 8, 1>} : memref<16x64xf32, #tpu.memory_space<vmem>>, vector<2x64xf32>
    %c0_93 = arith.constant 0 : index
    %c256 = arith.constant 256 : index
    %95 = vector.load %arg13[%c0_93, %c256] : memref<2x512xf32, #tpu.memory_space<vmem>>, vector<2x64xf32>
    tpu.vector_store %arg13[%c0_93, %c256], %94 {strides = array<i32>} : memref<2x512xf32, #tpu.memory_space<vmem>>, vector<2x64xf32>,
    %c5 = arith.constant 5 : index
    %c0_94 = arith.constant 0 : index
    %96 = tpu.strided_load %arg12[%c5, %c0_94] {strides = array<i32: 8, 1>} : memref<16x64xf32, #tpu.memory_space<vmem>>, vector<2x64xf32>
    %c0_95 = arith.constant 0 : index
    %c320 = arith.constant 320 : index
    %97 = vector.load %arg13[%c0_95, %c320] : memref<2x512xf32, #tpu.memory_space<vmem>>, vector<2x64xf32>
    tpu.vector_store %arg13[%c0_95, %c320], %96 {strides = array<i32>} : memref<2x512xf32, #tpu.memory_space<vmem>>, vector<2x64xf32>,
    %c6_96 = arith.constant 6 : index
    %c0_97 = arith.constant 0 : index
    %98 = tpu.strided_load %arg12[%c6_96, %c0_97] {strides = array<i32: 8, 1>} : memref<16x64xf32, #tpu.memory_space<vmem>>, vector<2x64xf32>
    %c0_98 = arith.constant 0 : index
    %c384 = arith.constant 384 : index
    %99 = vector.load %arg13[%c0_98, %c384] : memref<2x512xf32, #tpu.memory_space<vmem>>, vector<2x64xf32>
    tpu.vector_store %arg13[%c0_98, %c384], %98 {strides = array<i32>} : memref<2x512xf32, #tpu.memory_space<vmem>>, vector<2x64xf32>,
    %c7 = arith.constant 7 : index
    %c0_99 = arith.constant 0 : index
    %100 = tpu.strided_load %arg12[%c7, %c0_99] {strides = array<i32: 8, 1>} : memref<16x64xf32, #tpu.memory_space<vmem>>, vector<2x64xf32>
    %c0_100 = arith.constant 0 : index
    %c448 = arith.constant 448 : index
    %101 = vector.load %arg13[%c0_100, %c448] : memref<2x512xf32, #tpu.memory_space<vmem>>, vector<2x64xf32>
    tpu.vector_store %arg13[%c0_100, %c448], %100 {strides = array<i32>} : memref<2x512xf32, #tpu.memory_space<vmem>>, vector<2x64xf32>,
    %c0_101 = arith.constant 0 : index
    %c0_102 = arith.constant 0 : index
    %102 = vector.load %arg13[%c0_101, %c0_102] : memref<2x512xf32, #tpu.memory_space<vmem>>, vector<2x512xf32>
    %c0_103 = arith.constant 0 : index
    %c0_104 = arith.constant 0 : index
    %103 = vector.load %arg4[%c0_103, %c0_104] : memref<512x32xf32, #tpu.memory_space<vmem>>, vector<512x32xf32>
    %cst_105 = arith.constant dense<0.000000e+00> : vector<2x32xf32>
    %104 = tpu.matmul %102, %103, %cst_105 {dimension_numbers = #tpu.dot_dimension_numbers<[1], [0], [0], [1], [0, 0, 1, 1], [], []>} : vector<2x512xf32>, vector<512x32xf32>, vector<2x32xf32> -> vector<2x32xf32>
    %c0_106 = arith.constant 0 : index
    %c0_107 = arith.constant 0 : index
    %105 = vector.load %arg5[%c0_106, %c0_107] : memref<1x32xf32, #tpu.memory_space<vmem>>, vector<1x32xf32>
    %106 = vector.broadcast %105 : vector<1x32xf32> to vector<2x32xf32>
    %107 = arith.addf %104, %106 : vector<2x32xf32>
    %cst_108 = arith.constant 0.000000e+00 : f32
    %108 = vector.broadcast %cst_108 : f32 to vector<2x32xf32>
    %109 = arith.maximumf %107, %108 : vector<2x32xf32>
    %c0_109 = arith.constant 0 : index
    %c0_110 = arith.constant 0 : index
    %110 = vector.load %arg6[%c0_109, %c0_110] : memref<32x10xf32, #tpu.memory_space<vmem>>, vector<32x10xf32>
    %cst_111 = arith.constant dense<0.000000e+00> : vector<2x10xf32>
    %111 = tpu.matmul %109, %110, %cst_111 {dimension_numbers = #tpu.dot_dimension_numbers<[1], [0], [0], [1], [0, 0, 1, 1], [], []>} : vector<2x32xf32>, vector<32x10xf32>, vector<2x10xf32> -> vector<2x10xf32>
    %c0_112 = arith.constant 0 : index
    %c0_113 = arith.constant 0 : index
    %112 = vector.load %arg7[%c0_112, %c0_113] : memref<1x10xf32, #tpu.memory_space<vmem>>, vector<1x10xf32>
    %113 = vector.broadcast %112 : vector<1x10xf32> to vector<2x10xf32>
    %114 = arith.addf %111, %113 : vector<2x10xf32>
    %c0_114 = arith.constant 0 : index
    %c0_115 = arith.constant 0 : index
    %115 = vector.load %arg8[%c0_114, %c0_115] : memref<2x10xf32, #tpu.memory_space<vmem>>, vector<2x10xf32>
    tpu.vector_store %arg8[%c0_114, %c0_115], %114 {strides = array<i32>} : memref<2x10xf32, #tpu.memory_space<vmem>>, vector<2x10xf32>,
    return
  }
  func.func @transform_0(%arg0: i32) -> (i32, i32, i32) {
    %c0_i32 = arith.constant 0 : i32
    %c0_i32_0 = arith.constant 0 : i32
    %c0_i32_1 = arith.constant 0 : i32
    %c0_i32_2 = arith.constant 0 : i32
    return %c0_i32, %c0_i32_0, %c0_i32_1 : i32, i32, i32
  }
  func.func @transform_1(%arg0: i32) -> (i32, i32) {
    %c0_i32 = arith.constant 0 : i32
    %c0_i32_0 = arith.constant 0 : i32
    %c0_i32_1 = arith.constant 0 : i32
    return %c0_i32, %c0_i32_0 : i32, i32
  }
  func.func @transform_2(%arg0: i32) -> (i32, i32) {
    %c0_i32 = arith.constant 0 : i32
    %c0_i32_0 = arith.constant 0 : i32
    %c0_i32_1 = arith.constant 0 : i32
    return %c0_i32, %c0_i32_0 : i32, i32
  }
  func.func @transform_3(%arg0: i32) -> (i32, i32) {
    %c0_i32 = arith.constant 0 : i32
    %c0_i32_0 = arith.constant 0 : i32
    %c0_i32_1 = arith.constant 0 : i32
    return %c0_i32, %c0_i32_0 : i32, i32
  }
  func.func @transform_4(%arg0: i32) -> (i32, i32) {
    %c0_i32 = arith.constant 0 : i32
    %c0_i32_0 = arith.constant 0 : i32
    %c0_i32_1 = arith.constant 0 : i32
    return %c0_i32, %c0_i32_0 : i32, i32
  }
  func.func @transform_5(%arg0: i32) -> (i32, i32) {
    %c0_i32 = arith.constant 0 : i32
    %c0_i32_0 = arith.constant 0 : i32
    %c0_i32_1 = arith.constant 0 : i32
    return %c0_i32, %c0_i32_0 : i32, i32
  }
  func.func @transform_6(%arg0: i32) -> (i32, i32) {
    %c0_i32 = arith.constant 0 : i32
    %c0_i32_0 = arith.constant 0 : i32
    %c0_i32_1 = arith.constant 0 : i32
    return %c0_i32, %c0_i32_0 : i32, i32
  }
  func.func @transform_7(%arg0: i32) -> (i32, i32) {
    %c0_i32 = arith.constant 0 : i32
    %c0_i32_0 = arith.constant 0 : i32
    %c0_i32_1 = arith.constant 0 : i32
    return %c0_i32, %c0_i32_0 : i32, i32
  }
}

</mosaic_0001>

<bundles_post_ra>
// kernel: classification_cnn_forward.1
= control target key start
LH: loop header
LB: loop body
LE: loop exit
PB: predicated region body
PF: predicated region fallthrough
CT: control target
= control target key end

     0   :  { %vm27_vm0 = vcmask 490496   ;;  %s1250_s28 = smov 6   ;;  %vm30_vm1 = vcmask 486400   ;;  %v1251_v4 = vmov 0.0   ;;  %s1749_s0 = inlined_call_operand.vmem [shape: f32[2,16,48], index: 0, kind: input, shape index: {}]   ;;  %s1750_s1 = inlined_call_operand.vmem [shape: f32[300,128], index: 1, kind: input, shape index: {}]   ;;  %s1751_s2 = inlined_call_operand.vmem [shape: f32[1,128], index: 2, kind: input, shape index: {}]   ;;  %s1752_s3 = inlined_call_operand.vmem [shape: f32[512,32], index: 3, kind: input, shape index: {}]   ;;  %s1753_s4 = inlined_call_operand.vmem [shape: f32[1,32], index: 4, kind: input, shape index: {}]   ;;  %s1754_s5 = inlined_call_operand.vmem [shape: f32[32,10], index: 5, kind: input, shape index: {}]   ;;  %s1755_s6 = inlined_call_operand.vmem [shape: f32[1,10], index: 6, kind: input, shape index: {}]   ;;  %s1756_s7 = inlined_call_operand.hbm [shape: f32[2,10], index: 7, kind: output, shape index: {}]  }
   0x1   :  { %v35_v0 = vld [vmem:[%s1749_s0] sm:$0xff]  ;;  %v923_v1 = vld [vmem:[%s1749_s0 + $0x10] sm:$0xff]  ;;  %v36_v2 = vld [vmem:[%s1749_s0 + $0x8] sm:$0xff]  ;;  %28 = vst.msk [vmem:[#allocation2] sm:$0xff] %vm27_vm0, %v1251_v4 }
   0x2   :  { %39 = vrot.lane.b32.xlu0 %v35_v0, %s1250_s28  ;;  %53 = vrot.lane.b32.xlu1 %v923_v1, %s1250_s28  ;;  %v924_v3 = vld [vmem:[%s1749_s0 + $0x18] sm:$0xff]  ;;  %29 = vst.msk [vmem:[#allocation2 + $0x8] sm:$0xff] %vm27_vm0, %v1251_v4  ;;  %32 = vst.msk [vmem:[#allocation2 + $0x18] sm:$0xff] %vm27_vm0, %v1251_v4 }
   0x3   :  { %33 = vst.msk [vmem:[#allocation2 + $0x20] sm:$0xff] %vm27_vm0, %v1251_v4 }
   0x4   :  { %31 = vst.msk [vmem:[#allocation2 + $0x10] sm:$0xf] %vm30_vm1, %v1251_v4  ;;  %34 = vst.msk [vmem:[#allocation2 + $0x28] sm:$0xf] %vm30_vm1, %v1251_v4 }
   0x5   :  { %12 = vsyncpa [#allocation8], 0  ;;  %v208_v5 = vld [vmem:[%s1750_s1 + $0x80] sm:$0xff]  ;;  %v209_v6 = vld [vmem:[%s1750_s1 + $0x88] sm:$0xff]  ;;  %vm45_vm2 = vcmask 441392   ;;  %s1252_s17 = smov 120  }
   0x6   :  { %41 = vrot.lane.b32.xlu0 %v36_v2, %s1250_s28  ;;  %55 = vrot.lane.b32.xlu1 %v924_v3, %s1250_s28  ;;  %v192_v7 = vld [vmem:[%s1750_s1] sm:$0xff]  ;;  %v1092_v8 = vpack.c.bf16 %v209_v6, %v208_v5  ;;  %v193_v9 = vld [vmem:[%s1750_s1 + $0x8] sm:$0xff]  ;;  %s1253_s30 = smov 52   ;;  %s1254_s8 = smov 60   ;;  %vm249_vm3 = vcmask 1043456   ;;  %vm1256_vm4 = vmmov 1  }
   0x7   :  { %v210_v10 = vld [vmem:[%s1750_s1 + $0x90] sm:$0xff]  ;;  %v211_v11 = vld [vmem:[%s1750_s1 + $0x98] sm:$0xff]  ;;  %v1094_v12 = vpack.c.bf16 %v193_v9, %v192_v7  ;;  %v212_v16 = vld [vmem:[%s1750_s1 + $0xa0] sm:$0xff]  ;;  %s1255_s12 = smov 112   ;;  %vm91_vm6 = vcmask 424960   ;;  %vm105_vm7 = vcmask 916896  }
   0x8   :  { %v1096_v13 = vpack.c.bf16 %v211_v11, %v210_v10  ;;  %v194_v14 = vld [vmem:[%s1750_s1 + $0x10] sm:$0xff]  ;;  %v195_v15 = vld [vmem:[%s1750_s1 + $0x18] sm:$0xff]  ;;  %1093 = vmatprep.subr.bf16.mxu0 %v1092_v8  ;;  %v213_v17 = vld [vmem:[%s1750_s1 + $0xa8] sm:$0xff]  ;;  %vm76_vm8 = vcmask 982496   ;;  %vm89_vm9 = vcmask 1048512   ;;  %vm118_vm10 = vcmask 1048448  }
   0x9   :  { %1095 = vmatpush3.bf16.msra.mxu0 %v1094_v12  ;;  %v1098_v18 = vpack.c.bf16 %v195_v15, %v194_v14  ;;  %v1100_v19 = vpack.c.bf16 %v213_v17, %v212_v16  ;;  %v196_v20 = vld [vmem:[%s1750_s1 + $0x20] sm:$0xff]  ;;  %v197_v21 = vld [vmem:[%s1750_s1 + $0x28] sm:$0xff]  ;;  %v214_v22 = vld [vmem:[%s1750_s1 + $0xb0] sm:$0xff]  ;;  %vm120_vm11 = vcmask 359424   ;;  %vm450_vm12 = vcmask 64512   ;;  %s1258_s19 = smov 96  }
   0xa   :  { %1097 = vmatprep.subr.bf16.mxu0 %v1096_v13  ;;  %v215_v23 = vld [vmem:[%s1750_s1 + $0xb8] sm:$0xff]  ;;  %v1102_v24 = vpack.c.bf16 %v197_v21, %v196_v20  ;;  %v198_v26 = vld [vmem:[%s1750_s1 + $0x30] sm:$0xff]  ;;  %v216_v29 = vld [vmem:[%s1750_s1 + $0xc0] sm:$0xff]  ;;  %s1259_s20 = smov 88   ;;  %s1260_s21 = smov 80   ;;  %vm461_vm13 = vcmask 130112  }
   0xb   :  { %v1104_v25 = vpack.c.bf16 %v215_v23, %v214_v22  ;;  %v199_v27 = vld [vmem:[%s1750_s1 + $0x38] sm:$0xff]  ;;  %v217_v30 = vld [vmem:[%s1750_s1 + $0xc8] sm:$0xff]  ;;  %v200_v32 = vld [vmem:[%s1750_s1 + $0x40] sm:$0xff]  ;;  %s1261_s22 = smov 72   ;;  %vm470_vm14 = vcmask 195712   ;;  %vm479_vm15 = vcmask 261312  }
   0xc   :  { %v1106_v28 = vpack.c.bf16 %v199_v27, %v198_v26  ;;  %v1108_v31 = vpack.c.bf16 %v217_v30, %v216_v29  ;;  %v201_v33 = vld [vmem:[%s1750_s1 + $0x48] sm:$0xff]  ;;  %v218_v35 = vld [vmem:[%s1750_s1 + $0xd0] sm:$0xff]  ;;  %v219_v36 = vld [vmem:[%s1750_s1 + $0xd8] sm:$0xff]  ;;  %vm497_vm1 = vcmask 392512  }
   0xd   :  { %1099 = vmatpush3.bf16.msra.mxu0 %v1098_v18  ;;  %v1110_v34 = vpack.c.bf16 %v201_v33, %v200_v32  ;;  %v1112_v39 = vpack.c.bf16 %v219_v36, %v218_v35  ;;  %v202_v40 = vld [vmem:[%s1750_s1 + $0x50] sm:$0xff]  ;;  %v203_v41 = vld [vmem:[%s1750_s1 + $0x58] sm:$0xff]  ;;  %v220_v43 = vld [vmem:[%s1750_s1 + $0xe0] sm:$0xff] }
   0xe   :  { %1101 = vmatprep.subr.bf16.mxu0 %v1100_v19  ;;  %v1114_v42 = vpack.c.bf16 %v203_v41, %v202_v40  ;;  %v221_v44 = vld [vmem:[%s1750_s1 + $0xe8] sm:$0xff]  ;;  %v204_v48 = vld [vmem:[%s1750_s1 + $0x60] sm:$0xff]  ;;  %v222_v55 = vld [vmem:[%s1750_s1 + $0xf0] sm:$0xff] }
   0xf   :  { %v1116_v47 = vpack.c.bf16 %v221_v44, %v220_v43  ;;  %v205_v49 = vld [vmem:[%s1750_s1 + $0x68] sm:$0xff]  ;;  %v224_v53 = vld [vmem:[%s1750_s1 + $0x100] sm:$0xff]  ;;  %v223_v56 = vld [vmem:[%s1750_s1 + $0xf8] sm:$0xff] }
  0x10   :  { %v1118_v50 = vpack.c.bf16 %v205_v49, %v204_v48  ;;  %v225_v54 = vld [vmem:[%s1750_s1 + $0x108] sm:$0xff]  ;;  %v1120_v58 = vpack.c.bf16 %v223_v56, %v222_v55  ;;  %v206_v59 = vld [vmem:[%s1750_s1 + $0x70] sm:$0xff]  ;;  %v207_v60 = vld [vmem:[%s1750_s1 + $0x78] sm:$0xff] }
  0x11   :  { %1103 = vmatpush3.bf16.msra.mxu0 %v1102_v24  ;;  %v1124_v57 = vpack.c.bf16 %v225_v54, %v224_v53  ;;  %v1122_v0 = vpack.c.bf16 %v207_v60, %v206_v59  ;;  %v226_v5 = vld [vmem:[%s1750_s1 + $0x110] sm:$0xff]  ;;  %v227_v6 = vld [vmem:[%s1750_s1 + $0x118] sm:$0xff]  ;;  %v228_v8 = vld [vmem:[%s1750_s1 + $0x120] sm:$0xff] }
  0x12   :  { %1105 = vmatprep.subr.bf16.mxu0 %v1104_v25  ;;  %v1128_v7 = vpack.c.bf16 %v227_v6, %v226_v5  ;;  %v229_v9 = vld [vmem:[%s1750_s1 + $0x128] sm:$0xf]  ;;  %vm1133_vm5 = vmpackc.low %vm249_vm3, %vm1256_vm4  ;;  %v925_v54 = vld [vmem:[%s1751_s2] ss:$0 sm:$0xff]  ;;  %s1257_s2 = smov 104   ;;  %vm515_vm3 = vcmask 523712  }
  0x13   :  { %1125 = vmatprep.subr.bf16.mxu1 %v1124_v57  ;;  %v1132_v11 = vpack.c.bf16 %v229_v9, %v228_v8  ;;  %vm519_vm4 = vcmask 517120  }
  0x14   :  { %1127 = vmatpush3.bf16.msra.mxu1 %v1124_v57 }
  0x15   :  { %1107 = vmatpush3.bf16.msra.mxu0 %v1106_v28  ;;  %1129 = vmatprep.subr.bf16.mxu1 %v1128_v7 }
  0x16   :  { %1109 = vmatprep.subr.bf16.mxu0 %v1108_v31 }
  0x18   :  { %1131 = vmatpush3.bf16.msra.mxu1 %v1128_v7 }
  0x19   :  { %1111 = vmatpush3.bf16.msra.mxu0 %v1110_v34  ;;  %1134 = vmatprep.subr.msk.bf16.mxu1 %vm1133_vm5, %v1132_v11 }
  0x1a   :  { %1113 = vmatprep.subr.bf16.mxu0 %v1112_v39 }
  0x1c   :  { %1137 = vmatpush3.bf16.msk.msra.mxu1 %vm1133_vm5, %v1132_v11  ;;  %vm534_vm5 = vcmask 1041920  }
  0x1d   :  { %1115 = vmatpush3.bf16.msra.mxu0 %v1114_v42 }
  0x1e   :  { %1117 = vmatprep.subr.bf16.mxu0 %v1116_v47 }
  0x21   :  { %1119 = vmatpush3.bf16.msra.mxu0 %v1118_v50 }
  0x22   :  { %1121 = vmatprep.subr.bf16.mxu0 %v1120_v58 }
  0x25   :  { %1123 = vmatpush3.bf16.msra.mxu0 %v1122_v0 }
  0x74   :  { %v40_v37 = vpop.permute.xlu0 %39  ;;  %v54_v38 = vpop.permute.xlu1 %53 }
  0x75   :  { %46 = vst.msk [vmem:[#allocation2 + $0x2] sm:$0xff] %vm45_vm2, %v40_v37  ;;  %60 = vst.msk [vmem:[#allocation2 + $0x1a] sm:$0xff] %vm45_vm2, %v54_v38 }
  0x78   :  { %v42_v45 = vpop.permute.xlu0 %41  ;;  %v56_v46 = vpop.permute.xlu1 %55 }
  0x79   :  { %47 = vst.msk [vmem:[#allocation2 + $0xa] sm:$0xff] %vm45_vm2, %v42_v45  ;;  %61 = vst.msk [vmem:[#allocation2 + $0x22] sm:$0xff] %vm45_vm2, %v56_v46  ;;  %vm506_vm2 = vcmask 458112  }
  0x7c   :  { %v79_v51 = vld [vmem:[#allocation2 + $0x2] sm:$0xff]  ;;  %v124_v61 = vld [vmem:[#allocation2 + $0x18] sm:$0xff] }
  0x7d   :  { %83 = vrot.lane.b32.xlu0 %v79_v51, %s1252_s17  ;;  %v62_v52 = vld [vmem:[#allocation2] sm:$0xff]  ;;  %126 = vst.msk [vmem:[#allocation3 + $0x30] sm:$0xff] %vm27_vm0, %v124_v61 }
  0x7e   :  { %64 = vst.msk [vmem:[#allocation3] sm:$0xff] %vm27_vm0, %v62_v52  ;;  %v66_v63 = vld [vmem:[#allocation2 + $0x1] sm:$0xff]  ;;  %v128_v17 = vld [vmem:[#allocation2 + $0x19] sm:$0xff] }
  0x7f   :  { %v140_v14 = vld [vmem:[#allocation2 + $0x1a] sm:$0xff] }
  0x80   :  { %v95_v62 = vld [vmem:[#allocation2 + $0x3] sm:$0xff]  ;;  %v96_v12 = vld [vmem:[#allocation2 + $0xb] sm:$0xff]  ;;  %v154_v16 = vld [vmem:[#allocation2 + $0x1b] sm:$0xff] }
  0x81   :  { %99 = vrot.lane.b32.xlu1 %v95_v62, %s1253_s30  ;;  %70 = vrot.lane.b32.xlu0 %v66_v63, %s1254_s8  ;;  %v108_v1 = vld [vmem:[#allocation2 + $0x4] sm:$0xff]  ;;  %v109_v15 = vld [vmem:[#allocation2 + $0xc] sm:$0xff]  ;;  %v166_v18 = vld [vmem:[#allocation2 + $0x1c] sm:$0xff] }
  0x82   :  { %v80_v2 = vld [vmem:[#allocation2 + $0xa] sm:$0xff]  ;;  %v125_v10 = vld [vmem:[#allocation2 + $0x20] sm:$0xff] }
  0x83   :  { %v63_v3 = vld [vmem:[#allocation2 + $0x8] sm:$0xff]  ;;  %127 = vst.msk [vmem:[#allocation3 + $0x48] sm:$0xff] %vm27_vm0, %v125_v10 }
  0x84   :  { %65 = vst.msk [vmem:[#allocation3 + $0x18] sm:$0xff] %vm27_vm0, %v63_v3  ;;  %v67_v13 = vld [vmem:[#allocation2 + $0x9] sm:$0xff]  ;;  %v129_v21 = vld [vmem:[#allocation2 + $0x21] sm:$0xff]  ;;  %vm488_vm0 = vcmask 326912  }
  0x85   :  { %112 = vrot.lane.b32.xlu1 %v108_v1, %s1255_s12  ;;  %85 = vrot.lane.b32.xlu0 %v80_v2, %s1252_s17  ;;  %v141_v19 = vld [vmem:[#allocation2 + $0x22] sm:$0xff] }
  0x86   :  { %v155_v20 = vld [vmem:[#allocation2 + $0x23] sm:$0xff] }
  0x87   :  { %v167_v22 = vld [vmem:[#allocation2 + $0x24] sm:$0xff] }
  0x89   :  { %101 = vrot.lane.b32.xlu1 %v96_v12, %s1253_s30  ;;  %72 = vrot.lane.b32.xlu0 %v67_v13, %s1254_s8 }
  0x8d   :  { %114 = vrot.lane.b32.xlu1 %v109_v15, %s1255_s12  ;;  %144 = vrot.lane.b32.xlu0 %v140_v14, %s1252_s17 }
  0x91   :  { %158 = vrot.lane.b32.xlu1 %v154_v16, %s1253_s30  ;;  %132 = vrot.lane.b32.xlu0 %v128_v17, %s1254_s8 }
  0x95   :  { %170 = vrot.lane.b32.xlu1 %v166_v18, %s1255_s12  ;;  %146 = vrot.lane.b32.xlu0 %v141_v19, %s1252_s17 }
  0x99   :  { %160 = vrot.lane.b32.xlu1 %v155_v20, %s1253_s30  ;;  %134 = vrot.lane.b32.xlu0 %v129_v21, %s1254_s8  ;;  %s1263_s30 = smov 64   ;;  %s1266_s8 = smov [#allocation7]  }
  0x9a   :  { %s915_s9 = sshll.u32 %s1266_s8, 4  ;;  %s916_s9 = int_to_ptr.vmem [resolvable:$true] %s915_s9 }
  0x9b   :  { %p1231_p1 = scmp.lt.s32.totalorder %s916_s9, %s916_s9 }
  0x9d   :  { %172 = vrot.lane.b32.xlu1 %v167_v22, %s1255_s12 }
  0xef   :  { %v84_v23 = vpop.permute.xlu0 %83 }
  0xf0   :  { %92 = vst.msk [vmem:[#allocation3 + $0x8] sm:$0xff] %vm91_vm6, %v84_v23 }
  0xf3   :  { %v100_v24 = vpop.permute.xlu1 %99  ;;  %v71_v25 = vpop.permute.xlu0 %70 }
  0xf4   :  { %106 = vst.msk [vmem:[#allocation3 + $0x8] sm:$0xff] %vm105_vm7, %v100_v24 }
  0xf5   :  { %77 = vst.msk [vmem:[#allocation3] sm:$0xff] %vm76_vm8, %v71_v25 }
  0xf6   :  { %90 = vst.msk [vmem:[#allocation3] sm:$0xff] %vm89_vm9, %v84_v23 }
  0xf7   :  { %v113_v26 = vpop.permute.xlu1 %112  ;;  %v86_v27 = vpop.permute.xlu0 %85 }
  0xf8   :  { %119 = vst.msk [vmem:[#allocation3 + $0x8] sm:$0xff] %vm118_vm10, %v113_v26 }
  0xf9   :  { %121 = vst.msk [vmem:[#allocation3 + $0x10] sm:$0xff] %vm120_vm11, %v113_v26 }
  0xfa   :  { %94 = vst.msk [vmem:[#allocation3 + $0x20] sm:$0xff] %vm91_vm6, %v86_v27 }
  0xfb   :  { %v102_v28 = vpop.permute.xlu1 %101  ;;  %v73_v29 = vpop.permute.xlu0 %72 }
  0xfc   :  { %107 = vst.msk [vmem:[#allocation3 + $0x20] sm:$0xff] %vm105_vm7, %v102_v28  ;;  %v605_v28 = vld [vmem:[%s1752_s3 + $0x88] sm:$0xff] }
  0xfd   :  { %78 = vst.msk [vmem:[#allocation3 + $0x18] sm:$0xff] %vm76_vm8, %v73_v29  ;;  %v180_v34 = vld [vmem:[#allocation3] sm:$0xff]  ;;  %v588_v29 = vld [vmem:[%s1752_s3] sm:$0xff] }
  0xfe   :  { %93 = vst.msk [vmem:[#allocation3 + $0x18] sm:$0xff] %vm89_vm9, %v86_v27  ;;  %v604_v27 = vld [vmem:[%s1752_s3 + $0x80] sm:$0xff] }
  0xff   :  { %v115_v30 = vpop.permute.xlu1 %114  ;;  %v145_v31 = vpop.permute.xlu0 %144  ;;  %v181_v32 = vld [vmem:[#allocation3 + $0x8] sm:$0xff] }
 0x100   :  { %v182_v33 = vld [vmem:[#allocation3 + $0x10] sm:$0xff]  ;;  %122 = vst.msk [vmem:[#allocation3 + $0x20] sm:$0xff] %vm118_vm10, %v115_v30  ;;  %317 = vmatprep.mubr.f32.mxu0 %v181_v32 }
 0x101   :  { %123 = vst.msk [vmem:[#allocation3 + $0x28] sm:$0xff] %vm120_vm11, %v115_v30  ;;  %1075 = vmatprep.mubr.msk.f32.mxu1 %vm120_vm11, %v182_v33  ;;  %318 = vmatmul.mubr.f32.vlgmr.msra.gmra.mrb[0].mxu0 %v180_v34  ;;  %v1138_v30 = vpack.c.bf16 %v605_v28, %v604_v27  ;;  %v636_v32 = vld [vmem:[%s1752_s3 + $0x180] sm:$0xff]  ;;  %v637_v33 = vld [vmem:[%s1752_s3 + $0x188] sm:$0xff] }
 0x102   :  { %151 = vst.msk [vmem:[#allocation3 + $0x38] sm:$0xff] %vm91_vm6, %v145_v31  ;;  %v612_v27 = vld [vmem:[%s1752_s3 + $0xc0] sm:$0xff] }
 0x103   :  { %v159_v35 = vpop.permute.xlu1 %158  ;;  %v133_v36 = vpop.permute.xlu0 %132  ;;  %1139 = vmatprep.subr.bf16.mxu1 %v1138_v30  ;;  %v596_v30 = vld [vmem:[%s1752_s3 + $0x40] sm:$0xff] }
 0x104   :  { %164 = vst.msk [vmem:[#allocation3 + $0x38] sm:$0xff] %vm105_vm7, %v159_v35  ;;  %v1170_v35 = vpack.c.bf16 %v637_v33, %v636_v32 }
 0x105   :  { %138 = vst.msk [vmem:[#allocation3 + $0x30] sm:$0xff] %vm76_vm8, %v133_v36  ;;  %v183_v41 = vld [vmem:[#allocation3 + $0x18] sm:$0xff]  ;;  %v620_v36 = vld [vmem:[%s1752_s3 + $0x100] sm:$0xff] }
 0x106   :  { %150 = vst.msk [vmem:[#allocation3 + $0x30] sm:$0xff] %vm89_vm9, %v145_v31  ;;  %v589_v31 = vld [vmem:[%s1752_s3 + $0x8] sm:$0xff]  ;;  %1171 = vmatprep.subr.bf16.mxu0 %v1170_v35  ;;  %v644_v35 = vld [vmem:[%s1752_s3 + $0x1c0] sm:$0xff] }
 0x107   :  { %v171_v37 = vpop.permute.xlu1 %170  ;;  %v147_v38 = vpop.permute.xlu0 %146  ;;  %v184_v39 = vld [vmem:[#allocation3 + $0x20] sm:$0xff]  ;;  %v1140_v34 = vpack.c.bf16 %v589_v31, %v588_v29  ;;  %v613_v29 = vld [vmem:[%s1752_s3 + $0xc8] sm:$0xff] }
 0x108   :  { %v185_v40 = vld [vmem:[#allocation3 + $0x28] sm:$0xff]  ;;  %176 = vst.msk [vmem:[#allocation3 + $0x38] sm:$0xff] %vm118_vm10, %v171_v37  ;;  %322 = vmatprep.mubr.f32.mxu0 %v184_v39  ;;  %v597_v31 = vld [vmem:[%s1752_s3 + $0x48] sm:$0xff]  ;;  %v1154_v33 = vpack.c.bf16 %v613_v29, %v612_v27 }
 0x109   :  { %177 = vst.msk [vmem:[#allocation3 + $0x40] sm:$0xff] %vm120_vm11, %v171_v37  ;;  %1076 = vmatmul.mubr.msk.f32.vlgmr.msra.gmra.mrb[0].mxu1 %vm120_vm11, %v185_v40  ;;  %323 = vmatmul.mubr.f32.gmra.mrb[2].mxu0 %v183_v41  ;;  %v621_v37 = vld [vmem:[%s1752_s3 + $0x108] sm:$0xff]  ;;  %v607_v40 = vld [vmem:[%s1752_s3 + $0x98] sm:$0xff]  ;;  %v590_v41 = vld [vmem:[%s1752_s3 + $0x10] sm:$0xff] }
 0x10a   :  { %153 = vst.msk [vmem:[#allocation3 + $0x50] sm:$0xff] %vm91_vm6, %v147_v38  ;;  %v1172_v39 = vpack.c.bf16 %v621_v37, %v620_v36  ;;  %1141 = vmatpush3.bf16.msra.mxu1 %v1140_v34  ;;  %v1156_v34 = vpack.c.bf16 %v597_v31, %v596_v30  ;;  %v645_v36 = vld [vmem:[%s1752_s3 + $0x1c8] sm:$0xff]  ;;  %v635_v27 = vld [vmem:[%s1752_s3 + $0x178] sm:$0xff]  ;;  %vm1265_vm6 = vmmov 0  }
 0x10b   :  { %v161_v42 = vpop.permute.xlu1 %160  ;;  %v135_v43 = vpop.permute.xlu0 %134 }
 0x10c   :  { %165 = vst.msk [vmem:[#allocation3 + $0x50] sm:$0xff] %vm105_vm7, %v161_v42  ;;  %v591_v42 = vld [vmem:[%s1752_s3 + $0x18] sm:$0xff]  ;;  %1173 = vmatpush3.bf16.msra.mxu0 %v1172_v39  ;;  %v1186_v39 = vpack.c.bf16 %v645_v36, %v644_v35  ;;  %vm833_vm7 = vcmask 261120  }
 0x10d   :  { %139 = vst.msk [vmem:[#allocation3 + $0x48] sm:$0xff] %vm76_vm8, %v135_v43  ;;  %v186_v47 = vld [vmem:[#allocation3 + $0x30] sm:$0xff]  ;;  %vm907_vm8 = vcmask 74752  }
 0x10e   :  { %152 = vst.msk [vmem:[#allocation3 + $0x48] sm:$0xff] %vm89_vm9, %v147_v38  ;;  %v606_v38 = vld [vmem:[%s1752_s3 + $0x90] sm:$0xff] }
 0x10f   :  { %v173_v44 = vpop.permute.xlu1 %172  ;;  %v187_v45 = vld [vmem:[#allocation3 + $0x38] sm:$0xff]  ;;  %v1142_v43 = vpack.c.bf16 %v607_v40, %v606_v38  ;;  %v628_v40 = vld [vmem:[%s1752_s3 + $0x140] sm:$0xff] }
 0x110   :  { %v188_v46 = vld [vmem:[#allocation3 + $0x40] sm:$0xff]  ;;  %178 = vst.msk [vmem:[#allocation3 + $0x50] sm:$0xff] %vm118_vm10, %v173_v44  ;;  %327 = vmatprep.mubr.f32.mxu0 %v187_v45 }
 0x111   :  { %179 = vst.msk [vmem:[#allocation3 + $0x58] sm:$0xff] %vm120_vm11, %v173_v44  ;;  %1078 = vmatprep.mubr.msk.f32.mxu1 %vm120_vm11, %v188_v46  ;;  %328 = vmatmul.mubr.f32.gmra.mrb[4].mxu0 %v186_v47  ;;  %v1144_v44 = vpack.c.bf16 %v591_v42, %v590_v41  ;;  %v638_v45 = vld [vmem:[%s1752_s3 + $0x190] sm:$0xff]  ;;  %v639_v46 = vld [vmem:[%s1752_s3 + $0x198] sm:$0xff]  ;;  %v629_v41 = vld [vmem:[%s1752_s3 + $0x148] sm:$0xff] }
 0x112   :  { %v622_v47 = vld [vmem:[%s1752_s3 + $0x110] sm:$0xff]  ;;  %1143 = vmatprep.subr.bf16.mxu1 %v1142_v43  ;;  %v1188_v43 = vpack.c.bf16 %v629_v41, %v628_v40  ;;  %v823_v40 = vld [vmem:[%s1754_s5 + $0x8] sm:$0xff]  ;;  %v1264_v41 = vmov 0.0|0.0  }
 0x113   :  { %1145 = vmatpush3.bf16.msra.mxu1 %v1144_v44  ;;  %v614_v42 = vld [vmem:[%s1752_s3 + $0xd0] sm:$0xff]  ;;  %v615_v44 = vld [vmem:[%s1752_s3 + $0xd8] sm:$0xff] }
 0x115   :  { %v189_v50 = vld [vmem:[#allocation3 + $0x48] sm:$0xff] }
 0x117   :  { %v190_v48 = vld [vmem:[#allocation3 + $0x50] sm:$0xff] }
 0x118   :  { %v191_v49 = vld [vmem:[#allocation3 + $0x58] sm:$0xff]  ;;  %332 = vmatprep.mubr.f32.mxu0 %v190_v48  ;;  %v1174_v48 = vpack.c.bf16 %v639_v46, %v638_v45  ;;  %v598_v45 = vld [vmem:[%s1752_s3 + $0x50] sm:$0xff]  ;;  %v599_v46 = vld [vmem:[%s1752_s3 + $0x58] sm:$0xff] }
 0x119   :  { %1079 = vmatmul.mubr.msk.f32.gmra.mrb[2].mxu1 %vm120_vm11, %v191_v49  ;;  %333 = vmatmul.mubr.f32.gmra.mrb[6].mxu0 %v189_v50  ;;  %v623_v49 = vld [vmem:[%s1752_s3 + $0x118] sm:$0xff]  ;;  %v608_v50 = vld [vmem:[%s1752_s3 + $0xa0] sm:$0xff] }
 0x11a   :  { %1175 = vmatprep.subr.bf16.mxu0 %v1174_v48  ;;  %v1160_v48 = vpack.c.bf16 %v599_v46, %v598_v45 }
 0x1d4   :  { %v966_v51 = vpop.f32.mrb[0].mxu0 }
 0x1d5   :  { %v967_v52 = vpop.f32.mrb[1].mxu0 }
 0x1d6   :  { %v968_v53 = vadd.f32 %v967_v52, %v966_v51  ;;  %v609_v51 = vld [vmem:[%s1752_s3 + $0xa8] sm:$0xff]  ;;  %v1176_v52 = vpack.c.bf16 %v623_v49, %v622_v47  ;;  %v1158_v47 = vpack.c.bf16 %v615_v44, %v614_v42  ;;  %v646_v49 = vld [vmem:[%s1752_s3 + $0x1d0] sm:$0xff]  ;;  %v825_v44 = vld [vmem:[%s1754_s5 + $0x18] sm:$0xff] }
 0x1d8   :  { %v320_v56 = vadd.f32 %v968_v53, %v925_v54  ;;  %v1146_v53 = vpack.c.bf16 %v609_v51, %v608_v50  ;;  %1177 = vmatpush3.bf16.msra.mxu0 %v1176_v52  ;;  %v647_v50 = vld [vmem:[%s1752_s3 + $0x1d8] sm:$0xff]  ;;  %v630_v51 = vld [vmem:[%s1752_s3 + $0x150] sm:$0xff] }
 0x1da   :  { %1147 = vmatprep.subr.bf16.mxu1 %v1146_v53  ;;  %v1190_v53 = vpack.c.bf16 %v647_v50, %v646_v49 }
 0x1dc   :  { %v1077_v55 = vpop.f32.mrb[0].mxu1  ;;  %v969_v57 = vpop.f32.mrb[2].mxu0 }
 0x1dd   :  { %v404_v58 = vpop.f32.mrb[1].mxu1  ;;  %v970_v60 = vpop.f32.mrb[3].mxu0 }
 0x1de   :  { %v405_v59 = vadd.f32 %v404_v58, %v320_v56  ;;  %v971_v61 = vadd.f32 %v970_v60, %v969_v57  ;;  %v640_v56 = vld [vmem:[%s1752_s3 + $0x1a0] sm:$0xff]  ;;  %v641_v57 = vld [vmem:[%s1752_s3 + $0x1a8] sm:$0xff] }
 0x1df   :  { %v624_v58 = vld [vmem:[%s1752_s3 + $0x120] sm:$0xff] }
 0x1e0   :  { %v423_v62 = vmax.f32 %v405_v59, 0.0  ;;  %v325_v63 = vadd.f32 %v971_v61, %v925_v54  ;;  %v625_v59 = vld [vmem:[%s1752_s3 + $0x128] sm:$0xff]  ;;  %v1178_v61 = vpack.c.bf16 %v641_v57, %v640_v56 }
 0x1e1   :  { %v617_v56 = vld [vmem:[%s1752_s3 + $0xe8] sm:$0xff] }
 0x1e2   :  { %427 = vst [vmem:[#allocation4] sm:$0xff] %v423_v62  ;;  %v410_v0 = vadd.f32 %v1077_v55, %v325_v63  ;;  %v593_v55 = vld [vmem:[%s1752_s3 + $0x28] sm:$0xff]  ;;  %v610_v62 = vld [vmem:[%s1752_s3 + $0xb0] sm:$0xff]  ;;  %v611_v63 = vld [vmem:[%s1752_s3 + $0xb8] sm:$0xff]  ;;  %1179 = vmatprep.subr.bf16.mxu0 %v1178_v61 }
 0x1e3   :  { %v648_v61 = vld [vmem:[%s1752_s3 + $0x1e0] sm:$0xff] }
 0x1e4   :  { %v424_v1 = vmax.f32 %v410_v0, 0.0  ;;  %v972_v2 = vpop.f32.mrb[4].mxu0  ;;  %v594_v0 = vld [vmem:[%s1752_s3 + $0x30] sm:$0xff] }
 0x1e5   :  { %v973_v3 = vpop.f32.mrb[5].mxu0 }
 0x1e6   :  { %428 = vst [vmem:[#allocation4 + $0x8] sm:$0xff] %v424_v1  ;;  %v974_v5 = vadd.f32 %v973_v3, %v972_v2  ;;  %v1180_v1 = vpack.c.bf16 %v625_v59, %v624_v58  ;;  %v1150_v2 = vpack.c.bf16 %v611_v63, %v610_v62  ;;  %v595_v3 = vld [vmem:[%s1752_s3 + $0x38] sm:$0xff]  ;;  %v600_v59 = vld [vmem:[%s1752_s3 + $0x60] sm:$0xff]  ;;  %v649_v62 = vld [vmem:[%s1752_s3 + $0x1e8] sm:$0xff] }
 0x1e7   :  { %v632_v63 = vld [vmem:[%s1752_s3 + $0x160] sm:$0xff] }
 0x1e8   :  { %v330_v7 = vadd.f32 %v974_v5, %v925_v54  ;;  %v642_v5 = vld [vmem:[%s1752_s3 + $0x1b0] sm:$0xff]  ;;  %1181 = vmatpush3.bf16.msra.mxu0 %v1180_v1 }
 0x1ec   :  { %v1080_v6 = vpop.f32.mrb[2].mxu1  ;;  %v975_v8 = vpop.f32.mrb[6].mxu0 }
 0x1ed   :  { %v414_v9 = vpop.f32.mrb[3].mxu1  ;;  %v976_v11 = vpop.f32.mrb[7].mxu0  ;;  %v431_v12 = vld [vmem:[#allocation4] ss:$2 sm:$0xff]  ;;  %v435_v13 = vld [vmem:[#allocation4 + $0x1] ss:$2 sm:$0xff] }
 0x1ee   :  { %v415_v10 = vadd.f32 %v414_v9, %v330_v7  ;;  %v977_v14 = vadd.f32 %v976_v11, %v975_v8  ;;  %v438_v15 = vmax.f32 %v431_v12, %v435_v13  ;;  %v1152_v8 = vpack.c.bf16 %v595_v3, %v594_v0  ;;  %v633_v0 = vld [vmem:[%s1752_s3 + $0x168] sm:$0xff] }
 0x1f0   :  { %v425_v16 = vmax.f32 %v415_v10, 0.0  ;;  %v335_v17 = vadd.f32 %v977_v14, %v925_v54  ;;  %442 = vrot.lane.b32.xlu0 %v438_v15, %s1252_s17  ;;  %v592_v54 = vld [vmem:[%s1752_s3 + $0x20] sm:$0xff] }
 0x1f1   :  { %v1148_v60 = vpack.c.bf16 %v593_v55, %v592_v54  ;;  %v631_v54 = vld [vmem:[%s1752_s3 + $0x158] sm:$0xff]  ;;  %v616_v55 = vld [vmem:[%s1752_s3 + $0xe0] sm:$0xff] }
 0x1f2   :  { %429 = vst [vmem:[#allocation4 + $0x10] sm:$0xff] %v425_v16  ;;  %v420_v18 = vadd.f32 %v1080_v6, %v335_v17  ;;  %v643_v6 = vld [vmem:[%s1752_s3 + $0x1b8] sm:$0xff]  ;;  %v1192_v57 = vpack.c.bf16 %v631_v54, %v630_v51  ;;  %v1162_v58 = vpack.c.bf16 %v617_v56, %v616_v55 }
 0x1f3   :  { %v1182_v7 = vpack.c.bf16 %v643_v6, %v642_v5  ;;  %1149 = vmatpush3.bf16.msra.mxu1 %v1148_v60  ;;  %v601_v60 = vld [vmem:[%s1752_s3 + $0x68] sm:$0xff]  ;;  %v1194_v5 = vpack.c.bf16 %v649_v62, %v648_v61 }
 0x1f4   :  { %v426_v19 = vmax.f32 %v420_v18, 0.0  ;;  %1151 = vmatprep.subr.bf16.mxu1 %v1150_v2  ;;  %v1164_v3 = vpack.c.bf16 %v601_v60, %v600_v59 }
 0x1f5   :  { %1183 = vmatprep.subr.bf16.mxu0 %v1182_v7 }
 0x1f6   :  { %430 = vst [vmem:[#allocation4 + $0x18] sm:$0xff] %v426_v19 }
 0x1f7   :  { %1153 = vmatpush3.bf16.msra.mxu1 %v1152_v8 }
 0x1f8   :  { %1155 = vmatprep.subr.bf16.mxu1 %v1154_v33 }
 0x1fb   :  { %1157 = vmatpush3.bf16.msra.mxu1 %v1156_v34 }
 0x1fc   :  { %1159 = vmatprep.subr.bf16.mxu1 %v1158_v47  ;;  %v931_v47 = vld [vmem:[%s1753_s4] ss:$0 sm:$0xff]  ;;  %s1226_s4 = scalar_lea.vmem %s916_s9, 32 }
 0x1fd   :  { %v433_v20 = vld [vmem:[#allocation4 + $0x10] ss:$2 sm:$0xff]  ;;  %v437_v21 = vld [vmem:[#allocation4 + $0x11] ss:$2 sm:$0xff]  ;;  %p1227_p0 = scmp.ne.s32.totalorder %s916_s9, %s1226_s4  ;;  %p1232_p2 = scmp.lt.s32.totalorder %s1226_s4, %s1226_s4 }
 0x1fe   :  { %v439_v22 = vmax.f32 %v433_v20, %v437_v21 }
 0x1ff   :  { %1161 = vmatpush3.bf16.msra.mxu1 %v1160_v48  ;;  %p1233_p3 = por %p1232_p2, %p1231_p1 }
 0x200   :  { %444 = vrot.lane.b32.xlu1 %v439_v22, %s1252_s17  ;;  %1163 = vmatprep.subr.bf16.mxu1 %v1162_v58 }
 0x201   :  { %p1234_p4 = pnand %p1233_p3, %p1227_p0 }
 0x203   :  { %1165 = vmatpush3.bf16.msra.mxu1 %v1164_v3 }
 0x262   :  { %v443_v23 = vpop.permute.xlu0 %442 }
 0x263   :  { %v448_v24 = vmax.f32 %v438_v15, %v443_v23 }
 0x265   :  { %455 = vrot.lane.b32.xlu0 %v448_v24, %s1252_s17  ;;  %451 = vst.msk [vmem:[#allocation5] sm:$0xff] %vm450_vm12, %v448_v24 }
 0x269   :  { %464 = vrot.lane.b32.xlu0 %v448_v24, %s1255_s12 }
 0x26d   :  { %473 = vrot.lane.b32.xlu0 %v448_v24, %s1257_s2 }
 0x271   :  { %482 = vrot.lane.b32.xlu0 %v448_v24, %s1258_s19 }
 0x272   :  { %v445_v25 = vpop.permute.xlu1 %444 }
 0x273   :  { %v449_v26 = vmax.f32 %v439_v22, %v445_v25  ;;  %v1262_v22 = vmov 1983009808   ;;  %v626_v25 = vld [vmem:[%s1752_s3 + $0x130] sm:$0xff] }
 0x274   :  { %v525_v23 = vunpack.c.l.s4 %v1262_v22  ;;  %v650_v22 = vld [vmem:[%s1752_s3 + $0x1f0] sm:$0xff] }
 0x275   :  { %457 = vrot.lane.b32.xlu1 %v449_v26, %s1252_s17  ;;  %491 = vrot.lane.b32.xlu0 %v448_v24, %s1259_s20  ;;  %452 = vst.msk [vmem:[#allocation5 + $0x8] sm:$0xff] %vm450_vm12, %v449_v26 }
 0x276   :  { %v526_v37 = vunpack.c.0.s8 %v525_v23  ;;  %v651_v23 = vld [vmem:[%s1752_s3 + $0x1f8] sm:$0xff] }
 0x279   :  { %466 = vrot.lane.b32.xlu1 %v449_v26, %s1255_s12  ;;  %500 = vrot.lane.b32.xlu0 %v448_v24, %s1260_s21 }
 0x27d   :  { %475 = vrot.lane.b32.xlu1 %v449_v26, %s1257_s2  ;;  %509 = vrot.lane.b32.xlu0 %v448_v24, %s1261_s22  ;;  %v527_v24 = vlaneseq }
 0x27f   :  { %v528_v38 = vshrl.u32 %v527_v24, 7 }
 0x281   :  { %484 = vrot.lane.b32.xlu1 %v449_v26, %s1258_s19  ;;  %v1655_v52 = vsub.s32 %v526_v37, %v528_v38 }
 0x285   :  { %493 = vrot.lane.b32.xlu1 %v449_v26, %s1259_s20 }
 0x289   :  { %502 = vrot.lane.b32.xlu1 %v449_v26, %s1260_s21 }
 0x28d   :  { %511 = vrot.lane.b32.xlu1 %v449_v26, %s1261_s22  ;;  %v627_v26 = vld [vmem:[%s1752_s3 + $0x138] sm:$0xff] }
 0x28e   :  { %v1184_v28 = vpack.c.bf16 %v627_v26, %v626_v25  ;;  %v1198_v25 = vpack.c.bf16 %v651_v23, %v650_v22  ;;  %v634_v26 = vld [vmem:[%s1752_s3 + $0x170] sm:$0xff] }
 0x290   :  { %1185 = vmatpush3.bf16.msra.mxu0 %v1184_v28  ;;  %v1200_v28 = vpack.c.bf16 %v635_v27, %v634_v26 }
 0x291   :  { %1187 = vmatprep.subr.bf16.mxu0 %v1186_v39  ;;  %v822_v39 = vld [vmem:[%s1754_s5] sm:$0xff] }
 0x292   :  { %v1203_v42 = vpack.c.bf16 %v823_v40, %v822_v39 }
 0x294   :  { %1189 = vmatpush3.bf16.msra.mxu0 %v1188_v43  ;;  %v824_v43 = vld [vmem:[%s1754_s5 + $0x10] sm:$0xff] }
 0x295   :  { %1191 = vmatprep.subr.bf16.mxu0 %v1190_v53  ;;  %v1206_v45 = vpack.c.bf16 %v825_v44, %v824_v43 }
 0x298   :  { %1193 = vmatpush3.bf16.msra.mxu0 %v1192_v57 }
 0x299   :  { %1195 = vmatprep.subr.bf16.mxu0 %v1194_v5 }
 0x2d7   :  { %v456_v9 = vpop.permute.xlu0 %455 }
 0x2d8   :  { %462 = vst.msk [vmem:[#allocation5] sm:$0xff] %vm461_vm13, %v456_v9 }
 0x2db   :  { %v465_v10 = vpop.permute.xlu0 %464 }
 0x2dc   :  { %471 = vst.msk [vmem:[#allocation5] sm:$0xff] %vm470_vm14, %v465_v10  ;;  %v1196_v10 = vpack.c.bf16 %v633_v0, %v632_v63 }
 0x2de   :  { %1197 = vmatpush3.bf16.msra.mxu0 %v1196_v10 }
 0x2df   :  { %v474_v11 = vpop.permute.xlu0 %473  ;;  %1199 = vmatprep.subr.bf16.mxu0 %v1198_v25 }
 0x2e0   :  { %480 = vst.msk [vmem:[#allocation5] sm:$0xff] %vm479_vm15, %v474_v11 }
 0x2e2   :  { %1201 = vmatpush3.bf16.msra.mxu0 %v1200_v28 }
 0x2e3   :  { %v483_v12 = vpop.permute.xlu0 %482 }
 0x2e4   :  { %489 = vst.msk [vmem:[#allocation5] sm:$0xff] %vm488_vm0, %v483_v12 }
 0x2e7   :  { %v458_v13 = vpop.permute.xlu1 %457  ;;  %v492_v14 = vpop.permute.xlu0 %491 }
 0x2e8   :  { %463 = vst.msk [vmem:[#allocation5 + $0x8] sm:$0xff] %vm461_vm13, %v458_v13 }
 0x2e9   :  { %498 = vst.msk [vmem:[#allocation5] sm:$0xff] %vm497_vm1, %v492_v14 }
 0x2eb   :  { %v467_v15 = vpop.permute.xlu1 %466  ;;  %v501_v16 = vpop.permute.xlu0 %500 }
 0x2ec   :  { %472 = vst.msk [vmem:[#allocation5 + $0x8] sm:$0xff] %vm470_vm14, %v467_v15  ;;  %v618_v15 = vld [vmem:[%s1752_s3 + $0xf0] sm:$0xff] }
 0x2ed   :  { %507 = vst.msk [vmem:[#allocation5] sm:$0xff] %vm506_vm2, %v501_v16  ;;  %v619_v16 = vld [vmem:[%s1752_s3 + $0xf8] sm:$0xff] }
 0x2ef   :  { %v476_v17 = vpop.permute.xlu1 %475  ;;  %v510_v18 = vpop.permute.xlu0 %509 }
 0x2f0   :  { %481 = vst.msk [vmem:[#allocation5 + $0x8] sm:$0xff] %vm479_vm15, %v476_v17  ;;  %v602_v17 = vld [vmem:[%s1752_s3 + $0x70] sm:$0xff] }
 0x2f1   :  { %516 = vst.msk [vmem:[#allocation5] sm:$0xff] %vm515_vm3, %v510_v18 }
 0x2f3   :  { %v485_v19 = vpop.permute.xlu1 %484 }
 0x2f4   :  { %490 = vst.msk [vmem:[#allocation5 + $0x8] sm:$0xff] %vm488_vm0, %v485_v19 }
 0x2f7   :  { %v494_v20 = vpop.permute.xlu1 %493 }
 0x2f8   :  { %499 = vst.msk [vmem:[#allocation5 + $0x8] sm:$0xff] %vm497_vm1, %v494_v20  ;;  %v1166_v20 = vpack.c.bf16 %v619_v16, %v618_v15 }
 0x2fa   :  { %1167 = vmatprep.subr.bf16.mxu1 %v1166_v20 }
 0x2fb   :  { %v503_v21 = vpop.permute.xlu1 %502 }
 0x2fc   :  { %508 = vst.msk [vmem:[#allocation5 + $0x8] sm:$0xff] %vm506_vm2, %v503_v21  ;;  %v603_v21 = vld [vmem:[%s1752_s3 + $0x78] sm:$0xff] }
 0x2fd   :  { %v1168_v24 = vpack.c.bf16 %v603_v21, %v602_v17 }
 0x2ff   :  { %v512_v32 = vpop.permute.xlu1 %511  ;;  %1169 = vmatpush3.bf16.msra.mxu1 %v1168_v24 }
 0x300   :  { %517 = vst.msk [vmem:[#allocation5 + $0x8] sm:$0xff] %vm515_vm3, %v512_v32  ;;  %1202 = vmatprep.subr.bf16.mxu1 %v1264_v41 }
 0x307   :  { %v540_v1 = vld [vmem:[#allocation5 + $0x3] ss:$8 sm:$0x3]  ;;  %v522_v2 = vld [vmem:[#allocation5 + $0x1] ss:$8 sm:$0x3] }
 0x308   :  { %v548_v6 = vrot.slane %v540_v1, %v1655_v52  ;;  %v530_v7 = vrot.slane %v522_v2, %v1655_v52  ;;  %v574_v8 = vld [vmem:[#allocation5 + $0x7] ss:$8 sm:$0x3]  ;;  %v557_v9 = vld [vmem:[#allocation5 + $0x5] ss:$8 sm:$0x3] }
 0x309   :  { %v537_v11 = vld [vmem:[#allocation5 + $0x2] ss:$8 sm:$0x3]  ;;  %v518_v12 = vld [vmem:[#allocation5] ss:$8 sm:$0x3]  ;;  %v582_v18 = vrot.slane %v574_v8, %v1655_v52  ;;  %v565_v19 = vrot.slane %v557_v9, %v1655_v52 }
 0x30a   :  { %549 = vrot.lane.b32.xlu1 %v548_v6, %s1263_s30  ;;  %531 = vrot.lane.b32.xlu0 %v530_v7, %s1263_s30  ;;  %538 = vst.msk [vmem:[#allocation6 + $0x2] sm:$0x3] %vm519_vm4, %v537_v11  ;;  %520 = vst.msk [vmem:[#allocation6] sm:$0x3] %vm519_vm4, %v518_v12 }
 0x30b   :  { %v571_v13 = vld [vmem:[#allocation5 + $0x6] ss:$8 sm:$0x3]  ;;  %v554_v14 = vld [vmem:[#allocation5 + $0x4] ss:$8 sm:$0x3] }
 0x30c   :  { %572 = vst.msk [vmem:[#allocation6 + $0x6] sm:$0x3] %vm519_vm4, %v571_v13  ;;  %555 = vst.msk [vmem:[#allocation6 + $0x4] sm:$0x3] %vm519_vm4, %v554_v14 }
 0x30e   :  { %583 = vrot.lane.b32.xlu1 %v582_v18, %s1263_s30  ;;  %566 = vrot.lane.b32.xlu0 %v565_v19, %s1263_s30 }
 0x37c   :  { %v550_v29 = vpop.permute.xlu1 %549  ;;  %v532_v30 = vpop.permute.xlu0 %531 }
 0x37d   :  { %552 = vst.msk [vmem:[#allocation6 + $0x2] sm:$0x3] %vm534_vm5, %v550_v29  ;;  %535 = vst.msk [vmem:[#allocation6] sm:$0x3] %vm534_vm5, %v532_v30 }
 0x380   :  { %v584_v31 = vpop.permute.xlu1 %583  ;;  %v567_v32 = vpop.permute.xlu0 %566 }
 0x381   :  { %586 = vst.msk [vmem:[#allocation6 + $0x6] sm:$0x3] %vm534_vm5, %v584_v31  ;;  %569 = vst.msk [vmem:[#allocation6 + $0x4] sm:$0x3] %vm534_vm5, %v567_v32 }
 0x388   :  { %v587_v33 = vld [vmem:[#allocation6] sm:$0xff] }
 0x389   :  { %v667_v34 = vrot.slane %v587_v33, %v1655_v52  ;;  %v660_v35 = vcombine.high %v587_v33, %v587_v33 }
 0x38b   :  { %v675_v36 = vcombine.high %v667_v34, %v667_v34  ;;  %v674_v37 = vrot.slane %v660_v35, %v1655_v52 }
 0x38d   :  { %745 = vmatprep.mubr.f32.mxu1 %v675_v36  ;;  %v676_v38 = vcombine.high %v674_v37, %v674_v37 }
 0x38e   :  { %746 = vmatmul.mubr.f32.vlgmr.msra.gmra.mrb[4].mxu1 %v667_v34 }
 0x38f   :  { %815 = vmatprep.mubr.f32.mxu0 %v676_v38  ;;  %1204 = vmatpush3.bf16.msra.mxu1 %v1203_v42 }
 0x390   :  { %816 = vmatmul.mubr.f32.vlgmr.msra.gmra.mrb[8].mxu0 %v674_v37  ;;  %1205 = vmatprep.subr.bf16.mxu1 %v1264_v41 }
 0x391   :  { %1089 = vmatprep.mubr.msk.f32.mxu1 %vm1265_vm6, %v1251_v4  ;;  %v932_v4 = vld [vmem:[%s1755_s6] ss:$0 sm:$0xff] }
 0x393   :  { %1207 = vmatpush3.bf16.msra.mxu1 %v1206_v45 }
 0x461   :  { %v1020_v46 = vpop.f32.mrb[4].mxu1 }
 0x462   :  { %v1021_v48 = vpop.f32.mrb[5].mxu1 }
 0x463   :  { %v1022_v49 = vadd.f32 %v1021_v48, %v1020_v46  ;;  %v1055_v50 = vpop.f32.mrb[8].mxu0 }
 0x464   :  { %v1056_v51 = vpop.f32.mrb[9].mxu0 }
 0x465   :  { %v748_v52 = vadd.f32 %v1022_v49, %v931_v47  ;;  %v1057_v53 = vadd.f32 %v1056_v51, %v1055_v50 }
 0x467   :  { %v818_v54 = vadd.f32 %v1057_v53, %v748_v52 }
 0x469   :  { %v821_v55 = vmax.f32 %v818_v54, 0.0 }
 0x46b   :  { %1090 = vmatmul.mubr.msk.f32.vlgmr.msra.gmra.mrb[6].mxu1 %vm833_vm7, %v821_v55 }
 0x53e   :  { %v903_v56 = vpop.f32.mrb[6].mxu1 }
 0x53f   :  { %v904_v57 = vadd.f32 %v932_v4, %v903_v56  ;;  %v1091_v58 = vpop.f32.mrb[7].mxu1 }
 0x541   :  { %908 = vst.msk [vmem:[#allocation7] sm:$0x3] %vm907_vm8, %v904_v57 }
 0x542   :  { %1237 = shalt.err (!%p1234_p4)
}
 0x543   :  { %s1238_s11 = scalar_lea.hbm %s1756_s7, 32 }
 0x544   :  { %p1239_p5 = scmp.ne.s32.totalorder %s1756_s7, %s1238_s11  ;;  %p1242_p6 = scmp.lt.u32.totalorder %s1238_s11, %s1756_s7 }
 0x546   :  { %p1244_p7 = pnand %p1242_p6, %p1239_p5 }
 0x548   :  { %1247 = shalt.err (!%p1244_p7)
}
 0x549   :  { %918 = dma.vmem_to_hbm [thread:$0]  %s916_s9, 32, %s1756_s7, [#allocation8]  }
 0x54a   :  { %1248 = dma.done.wait [#allocation8], 32  }
 0x54b   :  { %1249 = vsyncadd [#allocation8], 4294967264 }
 0x54c   :  { %922 = vsyncpa [#allocation8], 1 }

</bundles_post_ra>
